<compile_context>
chip_gen: v7x
topology: tpu7x:2x2x1
jax: 0.10.0
libtpu: 0.0.40
codegen_flags: <defaults>
</compile_context>

<pallas_src>
import functools
import math

import jax
import jax.numpy as jnp
from jax.experimental import pallas as pl
from jax.experimental.pallas import tpu as pltpu

LANE = 128


def attentive_kernel(x_ref, w_ref, o_ref):
    # x_ref: (tm, W) row tile; w_ref: (1, W) per-lane scale broadcast over the
    # sublane/row axis; o_ref: (tm, W) output tile.  Pure VPU work.
    o_ref[...] = x_ref[...] * w_ref[...]


@functools.lru_cache(maxsize=1)
def _tpu_params():
    """(vmem_capacity_bytes, tensorcores_per_chip) with safe fallbacks."""
    vmem_cap = 64 << 20  # conservative fallback (v7x per-TC VMEM)
    try:
        cap = int(getattr(pltpu.get_tpu_info(), "vmem_capacity_bytes", 0))
        if cap > 0:
            vmem_cap = cap
    except Exception:
        pass
    num_cores = 1
    try:
        kind = str(getattr(jax.devices()[0], "device_kind", "")).lower()
        if "v7" in kind or "tpu7" in kind:
            num_cores = 2
    except Exception:
        pass
    return vmem_cap, num_cores


def attentive(x, w, *, tm=None, force_pallas=False):
    """y[i, j] = x[i, j] * w[j]  (== x @ diag(w))."""
    N, D = x.shape
    assert w.shape == (D,)
    itemsize = jnp.dtype(x.dtype).itemsize

    # ---- small-input fast path ---------------------------------------------
    # Below ~128 KiB the fixed custom-call / grid-step overhead dominates; a
    # fused XLA multiply is faster and avoids all layout plumbing.
    if not force_pallas and N * D * itemsize < (128 << 10):
        return x * w[None, :].astype(x.dtype)

    # ---- layout plumbing: present a lane-dense 2-D slab, copy-free ----------
    # r logical rows pack into one lcm(D,128)-lane row; the reshape is a
    # contiguous (row-major) bitcast, so it costs no HBM traffic.
    r = LANE // math.gcd(D, LANE)
    if r > 1 and N % r == 0:
        rows, width = N // r, D * r
        x2 = x.reshape(rows, width)
        w2 = jnp.tile(w, r).astype(x.dtype).reshape(1, width)
        unpack = lambda y: y.reshape(N, D)
    else:
        # Unpadded: last block dim equals the full array dim, so any non-128
        # lane tail is handled by Mosaic masking (no extra HBM passes).
        rows, width = N, D
        x2 = x
        w2 = w.astype(x.dtype).reshape(1, D)
        unpack = lambda y: y

    # ---- generation-aware tile selection -------------------------------------
    vmem_cap, num_cores = _tpu_params()
    # 2 input + 2 output double-buffered blocks live at once.
    footprint_budget = min(vmem_cap * 3 // 4, 72 << 20)   # 48 MiB v7x, 72 MiB v5e/v6e
    sublane = max(8, 32 // itemsize)                       # 8 f32 / 16 bf16 / 32 int8
    row_bytes = max(width * itemsize, 1)

    target_block = min(8 << 20, footprint_budget // 4)     # ~8 MiB blocks: roofline plateau
    tm_eff = max(sublane, target_block // row_bytes)
    if tm is not None:
        tm_eff = min(tm_eff, tm)
    tm_eff = min(tm_eff, rows)
    if tm_eff < rows:
        tm_eff = max(sublane, (tm_eff // sublane) * sublane)

    # Multi-TensorCore chips (v7x): ensure >= 2 grid steps and an even step
    # count so both cores' HBM streams stay busy.  Single-TC chips keep the
    # maximal tile (no pointless split -> fewer ~0.35 us grid-step overheads).
    if num_cores >= 2 and rows > 2 * sublane:
        half = max(sublane, ((pl.cdiv(rows, 2) + sublane - 1) // sublane) * sublane)
        tm_eff = min(tm_eff, half)
        steps = pl.cdiv(rows, tm_eff)
        if steps > 1 and steps % 2 == 1:
            tm_even = max(
                sublane,
                ((pl.cdiv(rows, steps + 1) + sublane - 1) // sublane) * sublane,
            )
            if tm_even < rows:
                tm_eff = tm_even

    grid = (pl.cdiv(rows, tm_eff),)

    # ---- explicit VMEM limit: actual footprint + small headroom --------------
    block_bytes = tm_eff * width * itemsize
    footprint = 4 * block_bytes + 4 * width * itemsize     # 2 in + 2 out bufs, + w
    vmem_limit = int(min(max(footprint + (2 << 20), 4 << 20), vmem_cap - (8 << 20)))

    cost = pl.CostEstimate(
        flops=rows * width,
        transcendentals=0,
        bytes_accessed=2 * rows * width * itemsize + width * itemsize,
    )

    out = pl.pallas_call(
        attentive_kernel,
        out_shape=jax.ShapeDtypeStruct((rows, width), x.dtype),
        grid_spec=pltpu.PrefetchScalarGridSpec(
            num_scalar_prefetch=0,
            grid=grid,
            in_specs=[
                pl.BlockSpec((tm_eff, width), lambda i: (i, 0)),  # x row tile
                pl.BlockSpec((1, width), lambda i: (0, 0)),       # w, resident
            ],
            out_specs=pl.BlockSpec((tm_eff, width), lambda i: (i, 0)),
        ),
        compiler_params=pltpu.CompilerParams(
            dimension_semantics=("parallel",),
            vmem_limit_bytes=vmem_limit,
        ),
        cost_estimate=cost,
    )(x2, w2)
    return unpack(out)


if __name__ == "__main__":
    key = jax.random.PRNGKey(0)
    ks = jax.random.split(key, 10)

    def check(y, x, w):
        assert y.shape == x.shape
        assert jnp.allclose(y, x * w[None, :], atol=1e-6, rtol=1e-6), "mismatch"

    # 1) Streaming-sized demo that exercises the Pallas kernel (lane-dense D).
    x_big = jax.random.normal(ks[0], (1024, 128), dtype=jnp.float32)
    w_big = jax.random.normal(ks[1], (128,), dtype=jnp.float32)
    y_big = attentive(x_big, w_big)
    jax.block_until_ready(y_big)
    check(y_big, x_big, w_big)

    # 2) Original-module scale (isize=32, batch=16): small-input fast path ...
    x = jax.random.normal(ks[2], (16, 32), dtype=jnp.float32)
    w = jax.random.normal(ks[3], (32,), dtype=jnp.float32)
    y = attentive(x, w)
    jax.block_until_ready(y)
    check(y, x, w)
    # ... and the same shape through the Pallas row-packed path (r = 4).
    y_p = attentive(x, w, force_pallas=True)
    jax.block_until_ready(y_p)
    check(y_p, x, w)

    # 3) Ragged row count (N % r != 0): copy-free unpacked masked-lane path.
    x10 = jax.random.normal(ks[4], (10, 32), dtype=jnp.float32)
    y10 = attentive(x10, w, force_pallas=True)
    jax.block_until_ready(y10)
    check(y10, x10, w)

    # 4) D=48 (shares a factor with 128): packed 8 rows per 384-lane row.
    x48 = jax.random.normal(ks[5], (16, 48), dtype=jnp.float32)
    w48 = jax.random.normal(ks[6], (48,), dtype=jnp.float32)
    y48 = attentive(x48, w48, force_pallas=True)
    jax.block_until_ready(y48)
    check(y48, x48, w48)

    # 5) D=200: unpadded full-extent lane block (Mosaic masks the tail lanes).
    x200 = jax.random.normal(ks[7], (24, 200), dtype=jnp.float32)
    w200 = jax.random.normal(ks[8], (200,), dtype=jnp.float32)
    y200 = attentive(x200, w200, force_pallas=True)
    jax.block_until_ready(y200)
    check(y200, x200, w200)

    print("KERNEL_OK")
</pallas_src>

<mosaic_0001>
module attributes {stable_mosaic.version = 11 : i64} {
  func.func @attentive_kernel(%arg0: i32, %arg1: memref<1024x128xf32, #tpu.memory_space<vmem>>, %arg2: memref<1x128xf32, #tpu.memory_space<vmem>>, %arg3: memref<1024x128xf32, #tpu.memory_space<vmem>>) attributes {dimension_semantics = [#tpu.dimension_semantics<parallel>], iteration_bounds = array<i64: 1>, scalar_prefetch = 0 : i64, scratch_operands = 0 : i64, tpu.core_type = #tpu.core_type<tc>, window_params = [{transform_indices = @transform_0, window_bounds = array<i64: 1024, 128>}, {pipeline_mode = #tpu.pipeline_mode<synchronous>, transform_indices = @transform_1, window_bounds = array<i64: 1, 128>}, {transform_indices = @transform_2, window_bounds = array<i64: 1024, 128>}]} {
    %c0 = arith.constant 0 : index
    %c0_0 = arith.constant 0 : index
    %0 = vector.load %arg1[%c0, %c0_0] : memref<1024x128xf32, #tpu.memory_space<vmem>>, vector<1024x128xf32>
    %c0_1 = arith.constant 0 : index
    %c0_2 = arith.constant 0 : index
    %1 = vector.load %arg2[%c0_1, %c0_2] : memref<1x128xf32, #tpu.memory_space<vmem>>, vector<1x128xf32>
    %2 = vector.broadcast %1 : vector<1x128xf32> to vector<1024x128xf32>
    %3 = arith.mulf %0, %2 : vector<1024x128xf32>
    %c0_3 = arith.constant 0 : index
    %c0_4 = arith.constant 0 : index
    %4 = vector.load %arg3[%c0_3, %c0_4] : memref<1024x128xf32, #tpu.memory_space<vmem>>, vector<1024x128xf32>
    tpu.vector_store %arg3[%c0_3, %c0_4], %3 {strides = array<i32>} : memref<1024x128xf32, #tpu.memory_space<vmem>>, vector<1024x128xf32>,
    return
  }
  func.func @transform_0(%arg0: i32) -> (i32, i32) {
    %c0_i32 = arith.constant 0 : i32
    %c0_i32_0 = arith.constant 0 : i32
    return %arg0, %c0_i32 : i32, i32
  }
  func.func @transform_1(%arg0: i32) -> (i32, i32) {
    %c0_i32 = arith.constant 0 : i32
    %c0_i32_0 = arith.constant 0 : i32
    %c0_i32_1 = arith.constant 0 : i32
    return %c0_i32, %c0_i32_0 : i32, i32
  }
  func.func @transform_2(%arg0: i32) -> (i32, i32) {
    %c0_i32 = arith.constant 0 : i32
    %c0_i32_0 = arith.constant 0 : i32
    return %arg0, %c0_i32 : i32, i32
  }
}

</mosaic_0001>

<bundles_post_ra>
// kernel: tpu_custom_call.1
= control target key start
LH: loop header
LB: loop body
LE: loop exit
PB: predicated region body
PF: predicated region fallthrough
CT: control target
= control target key end

     0   :  { %7 = vsyncpa [#allocation3], 0  ;;  %s669_s0 = inlined_call_operand.hbm [shape: f32[1024,128], index: 0, kind: input, shape index: {}]   ;;  %s670_s1 = inlined_call_operand.vmem [shape: f32[1,128], index: 1, kind: input, shape index: {}]   ;;  %s671_s2 = inlined_call_operand.hbm [shape: f32[1024,128], index: 2, kind: output, shape index: {}]  }
   0x1   :  { %8 = vsyncpa [#allocation4], 0  ;;  %s487_s9 = smov [#allocation2]   ;;  %s439_s13 = scalar_lea.hbm %s669_s0, 16384 }
   0x2   :  { %s14_s10 = sshll.u32 %s487_s9, 4  ;;  %p440_p0 = scmp.ne.s32.totalorder %s669_s0, %s439_s13  ;;  %s15_s10 = int_to_ptr.vmem [resolvable:$true] %s14_s10 }
   0x3   :  { %p443_p1 = scmp.lt.u32.totalorder %s439_s13, %s669_s0 }
   0x5   :  { %p445_p2 = pnand %p443_p1, %p440_p0 }
   0x7   :  { %448 = shalt.err (!%p445_p2)
}
   0x8   :  { %s449_s18 = scalar_lea.vmem %s15_s10, 16384  ;;  %p454_p4 = scmp.lt.s32.totalorder %s15_s10, %s15_s10 }
   0x9   :  { %p450_p3 = scmp.ne.s32.totalorder %s15_s10, %s449_s18  ;;  %p455_p5 = scmp.lt.s32.totalorder %s449_s18, %s449_s18 }
   0xb   :  { %p456_p6 = por %p455_p5, %p454_p4 }
   0xd   :  { %p457_p7 = pnand %p456_p6, %p450_p3 }
   0xf   :  { %460 = shalt.err (!%p457_p7)
}
  0x10   :  { %s488_s19 = smov 128   ;;  %s489_s20 = smov 8  }
  0x11   :  { %20 = dma.hbm_to_vmem [thread:$0]  %s669_s0, 16384, %s15_s10, [#allocation3], %s488_s19, %s488_s19, %s489_s20  }
  0x12   :  { %483 = dma.done.wait [#allocation3], 16384  }
  0x13   :  { %484 = vsyncadd [#allocation3], 4294950912  ;;  %v26_v0 = vld [vmem:[#allocation2] sm:$0xff]  ;;  %v27_v2 = vld [vmem:[#allocation2 + $0x8] sm:$0xff]  ;;  %s490_s0 = smov [#allocation5]  }
  0x14   :  { %v524_v1 = vld [vmem:[%s670_s1] ss:$0 sm:$0xff]  ;;  %v28_v5 = vld [vmem:[#allocation2 + $0x10] sm:$0xff]  ;;  %v29_v6 = vld [vmem:[#allocation2 + $0x18] sm:$0xff]  ;;  %s422_s1 = sshll.u32 %s490_s0, 4  ;;  %s423_s1 = int_to_ptr.vmem [resolvable:$true] %s422_s1 }
  0x15   :  { %v161_v3 = vmul.f32 %v524_v1, %v26_v0  ;;  %v162_v4 = vmul.f32 %v524_v1, %v27_v2  ;;  %v30_v7 = vld [vmem:[#allocation2 + $0x20] sm:$0xff]  ;;  %v163_v8 = vmul.f32 %v524_v1, %v28_v5  ;;  %v164_v9 = vmul.f32 %v524_v1, %v29_v6  ;;  %v31_v11 = vld [vmem:[#allocation2 + $0x28] sm:$0xff]  ;;  %v32_v12 = vld [vmem:[#allocation2 + $0x30] sm:$0xff]  ;;  %s461_s25 = scalar_lea.vmem %s423_s1, 16384  ;;  %p466_p9 = scmp.lt.s32.totalorder %s423_s1, %s423_s1 }
  0x16   :  { %v165_v10 = vmul.f32 %v524_v1, %v30_v7  ;;  %v33_v13 = vld [vmem:[#allocation2 + $0x38] sm:$0xff]  ;;  %v166_v14 = vmul.f32 %v524_v1, %v31_v11  ;;  %v167_v15 = vmul.f32 %v524_v1, %v32_v12  ;;  %v34_v17 = vld [vmem:[#allocation2 + $0x40] sm:$0xff]  ;;  %v35_v18 = vld [vmem:[#allocation2 + $0x48] sm:$0xff]  ;;  %p462_p8 = scmp.ne.s32.totalorder %s423_s1, %s461_s25  ;;  %p467_p10 = scmp.lt.s32.totalorder %s461_s25, %s461_s25 }
  0x17   :  { %289 = vst [vmem:[#allocation5] sm:$0xff] %v161_v3  ;;  %290 = vst [vmem:[#allocation5 + $0x8] sm:$0xff] %v162_v4  ;;  %v168_v16 = vmul.f32 %v524_v1, %v33_v13  ;;  %v36_v19 = vld [vmem:[#allocation2 + $0x50] sm:$0xff]  ;;  %v169_v20 = vmul.f32 %v524_v1, %v34_v17  ;;  %v170_v21 = vmul.f32 %v524_v1, %v35_v18  ;;  %v37_v23 = vld [vmem:[#allocation2 + $0x58] sm:$0xff] }
  0x18   :  { %291 = vst [vmem:[#allocation5 + $0x10] sm:$0xff] %v163_v8  ;;  %292 = vst [vmem:[#allocation5 + $0x18] sm:$0xff] %v164_v9  ;;  %v171_v22 = vmul.f32 %v524_v1, %v36_v19  ;;  %v38_v24 = vld [vmem:[#allocation2 + $0x60] sm:$0xff]  ;;  %v39_v25 = vld [vmem:[#allocation2 + $0x68] sm:$0xff]  ;;  %v172_v26 = vmul.f32 %v524_v1, %v37_v23  ;;  %p468_p11 = por %p467_p10, %p466_p9 }
  0x19   :  { %293 = vst [vmem:[#allocation5 + $0x20] sm:$0xff] %v165_v10  ;;  %294 = vst [vmem:[#allocation5 + $0x28] sm:$0xff] %v166_v14  ;;  %v173_v27 = vmul.f32 %v524_v1, %v38_v24  ;;  %v174_v28 = vmul.f32 %v524_v1, %v39_v25  ;;  %v40_v29 = vld [vmem:[#allocation2 + $0x70] sm:$0xff]  ;;  %v41_v30 = vld [vmem:[#allocation2 + $0x78] sm:$0xff] }
  0x1a   :  { %295 = vst [vmem:[#allocation5 + $0x30] sm:$0xff] %v167_v15  ;;  %296 = vst [vmem:[#allocation5 + $0x38] sm:$0xff] %v168_v16  ;;  %v42_v31 = vld [vmem:[#allocation2 + $0x80] sm:$0xff]  ;;  %v175_v32 = vmul.f32 %v524_v1, %v40_v29  ;;  %v176_v33 = vmul.f32 %v524_v1, %v41_v30  ;;  %v43_v35 = vld [vmem:[#allocation2 + $0x88] sm:$0xff]  ;;  %p469_p12 = pnand %p468_p11, %p462_p8 }
  0x1b   :  { %297 = vst [vmem:[#allocation5 + $0x40] sm:$0xff] %v169_v20  ;;  %298 = vst [vmem:[#allocation5 + $0x48] sm:$0xff] %v170_v21  ;;  %v177_v34 = vmul.f32 %v524_v1, %v42_v31  ;;  %v44_v36 = vld [vmem:[#allocation2 + $0x90] sm:$0xff]  ;;  %v45_v37 = vld [vmem:[#allocation2 + $0x98] sm:$0xff]  ;;  %v178_v38 = vmul.f32 %v524_v1, %v43_v35 }
  0x1c   :  { %299 = vst [vmem:[#allocation5 + $0x50] sm:$0xff] %v171_v22  ;;  %300 = vst [vmem:[#allocation5 + $0x58] sm:$0xff] %v172_v26  ;;  %v179_v39 = vmul.f32 %v524_v1, %v44_v36  ;;  %v180_v40 = vmul.f32 %v524_v1, %v45_v37  ;;  %v46_v41 = vld [vmem:[#allocation2 + $0xa0] sm:$0xff]  ;;  %v47_v42 = vld [vmem:[#allocation2 + $0xa8] sm:$0xff] }
  0x1d   :  { %301 = vst [vmem:[#allocation5 + $0x60] sm:$0xff] %v173_v27  ;;  %302 = vst [vmem:[#allocation5 + $0x68] sm:$0xff] %v174_v28  ;;  %v48_v43 = vld [vmem:[#allocation2 + $0xb0] sm:$0xff]  ;;  %v181_v44 = vmul.f32 %v524_v1, %v46_v41  ;;  %v182_v45 = vmul.f32 %v524_v1, %v47_v42  ;;  %v49_v47 = vld [vmem:[#allocation2 + $0xb8] sm:$0xff] }
  0x1e   :  { %303 = vst [vmem:[#allocation5 + $0x70] sm:$0xff] %v175_v32  ;;  %304 = vst [vmem:[#allocation5 + $0x78] sm:$0xff] %v176_v33  ;;  %v183_v46 = vmul.f32 %v524_v1, %v48_v43  ;;  %v50_v48 = vld [vmem:[#allocation2 + $0xc0] sm:$0xff]  ;;  %v51_v49 = vld [vmem:[#allocation2 + $0xc8] sm:$0xff]  ;;  %v184_v50 = vmul.f32 %v524_v1, %v49_v47 }
  0x1f   :  { %305 = vst [vmem:[#allocation5 + $0x80] sm:$0xff] %v177_v34  ;;  %306 = vst [vmem:[#allocation5 + $0x88] sm:$0xff] %v178_v38  ;;  %v185_v51 = vmul.f32 %v524_v1, %v50_v48  ;;  %v186_v52 = vmul.f32 %v524_v1, %v51_v49  ;;  %v52_v53 = vld [vmem:[#allocation2 + $0xd0] sm:$0xff]  ;;  %v53_v54 = vld [vmem:[#allocation2 + $0xd8] sm:$0xff] }
  0x20   :  { %307 = vst [vmem:[#allocation5 + $0x90] sm:$0xff] %v179_v39  ;;  %308 = vst [vmem:[#allocation5 + $0x98] sm:$0xff] %v180_v40  ;;  %v54_v55 = vld [vmem:[#allocation2 + $0xe0] sm:$0xff]  ;;  %v187_v56 = vmul.f32 %v524_v1, %v52_v53  ;;  %v188_v57 = vmul.f32 %v524_v1, %v53_v54  ;;  %v55_v59 = vld [vmem:[#allocation2 + $0xe8] sm:$0xff] }
  0x21   :  { %309 = vst [vmem:[#allocation5 + $0xa0] sm:$0xff] %v181_v44  ;;  %310 = vst [vmem:[#allocation5 + $0xa8] sm:$0xff] %v182_v45  ;;  %v189_v58 = vmul.f32 %v524_v1, %v54_v55  ;;  %v56_v60 = vld [vmem:[#allocation2 + $0xf0] sm:$0xff]  ;;  %v57_v61 = vld [vmem:[#allocation2 + $0xf8] sm:$0xff]  ;;  %v190_v62 = vmul.f32 %v524_v1, %v55_v59 }
  0x22   :  { %311 = vst [vmem:[#allocation5 + $0xb0] sm:$0xff] %v183_v46  ;;  %312 = vst [vmem:[#allocation5 + $0xb8] sm:$0xff] %v184_v50  ;;  %v191_v63 = vmul.f32 %v524_v1, %v56_v60  ;;  %v192_v0 = vmul.f32 %v524_v1, %v57_v61  ;;  %v58_v2 = vld [vmem:[#allocation2 + $0x100] sm:$0xff]  ;;  %v59_v3 = vld [vmem:[#allocation2 + $0x108] sm:$0xff] }
  0x23   :  { %313 = vst [vmem:[#allocation5 + $0xc0] sm:$0xff] %v185_v51  ;;  %314 = vst [vmem:[#allocation5 + $0xc8] sm:$0xff] %v186_v52  ;;  %v60_v4 = vld [vmem:[#allocation2 + $0x110] sm:$0xff]  ;;  %v193_v5 = vmul.f32 %v524_v1, %v58_v2  ;;  %v194_v6 = vmul.f32 %v524_v1, %v59_v3  ;;  %v61_v8 = vld [vmem:[#allocation2 + $0x118] sm:$0xff] }
  0x24   :  { %315 = vst [vmem:[#allocation5 + $0xd0] sm:$0xff] %v187_v56  ;;  %316 = vst [vmem:[#allocation5 + $0xd8] sm:$0xff] %v188_v57  ;;  %v195_v7 = vmul.f32 %v524_v1, %v60_v4  ;;  %v62_v9 = vld [vmem:[#allocation2 + $0x120] sm:$0xff]  ;;  %v63_v10 = vld [vmem:[#allocation2 + $0x128] sm:$0xff]  ;;  %v196_v11 = vmul.f32 %v524_v1, %v61_v8 }
  0x25   :  { %317 = vst [vmem:[#allocation5 + $0xe0] sm:$0xff] %v189_v58  ;;  %318 = vst [vmem:[#allocation5 + $0xe8] sm:$0xff] %v190_v62  ;;  %v197_v12 = vmul.f32 %v524_v1, %v62_v9  ;;  %v198_v13 = vmul.f32 %v524_v1, %v63_v10  ;;  %v64_v14 = vld [vmem:[#allocation2 + $0x130] sm:$0xff]  ;;  %v65_v15 = vld [vmem:[#allocation2 + $0x138] sm:$0xff] }
  0x26   :  { %319 = vst [vmem:[#allocation5 + $0xf0] sm:$0xff] %v191_v63  ;;  %320 = vst [vmem:[#allocation5 + $0xf8] sm:$0xff] %v192_v0  ;;  %v66_v16 = vld [vmem:[#allocation2 + $0x140] sm:$0xff]  ;;  %v199_v17 = vmul.f32 %v524_v1, %v64_v14  ;;  %v200_v18 = vmul.f32 %v524_v1, %v65_v15  ;;  %v67_v20 = vld [vmem:[#allocation2 + $0x148] sm:$0xff] }
  0x27   :  { %321 = vst [vmem:[#allocation5 + $0x100] sm:$0xff] %v193_v5  ;;  %322 = vst [vmem:[#allocation5 + $0x108] sm:$0xff] %v194_v6  ;;  %v201_v19 = vmul.f32 %v524_v1, %v66_v16  ;;  %v68_v21 = vld [vmem:[#allocation2 + $0x150] sm:$0xff]  ;;  %v69_v22 = vld [vmem:[#allocation2 + $0x158] sm:$0xff]  ;;  %v202_v23 = vmul.f32 %v524_v1, %v67_v20 }
  0x28   :  { %323 = vst [vmem:[#allocation5 + $0x110] sm:$0xff] %v195_v7  ;;  %324 = vst [vmem:[#allocation5 + $0x118] sm:$0xff] %v196_v11  ;;  %v203_v24 = vmul.f32 %v524_v1, %v68_v21  ;;  %v204_v25 = vmul.f32 %v524_v1, %v69_v22  ;;  %v70_v26 = vld [vmem:[#allocation2 + $0x160] sm:$0xff]  ;;  %v71_v27 = vld [vmem:[#allocation2 + $0x168] sm:$0xff] }
  0x29   :  { %325 = vst [vmem:[#allocation5 + $0x120] sm:$0xff] %v197_v12  ;;  %326 = vst [vmem:[#allocation5 + $0x128] sm:$0xff] %v198_v13  ;;  %v72_v28 = vld [vmem:[#allocation2 + $0x170] sm:$0xff]  ;;  %v205_v29 = vmul.f32 %v524_v1, %v70_v26  ;;  %v206_v30 = vmul.f32 %v524_v1, %v71_v27  ;;  %v73_v32 = vld [vmem:[#allocation2 + $0x178] sm:$0xff] }
  0x2a   :  { %327 = vst [vmem:[#allocation5 + $0x130] sm:$0xff] %v199_v17  ;;  %328 = vst [vmem:[#allocation5 + $0x138] sm:$0xff] %v200_v18  ;;  %v207_v31 = vmul.f32 %v524_v1, %v72_v28  ;;  %v74_v33 = vld [vmem:[#allocation2 + $0x180] sm:$0xff]  ;;  %v75_v34 = vld [vmem:[#allocation2 + $0x188] sm:$0xff]  ;;  %v208_v35 = vmul.f32 %v524_v1, %v73_v32 }
  0x2b   :  { %329 = vst [vmem:[#allocation5 + $0x140] sm:$0xff] %v201_v19  ;;  %330 = vst [vmem:[#allocation5 + $0x148] sm:$0xff] %v202_v23  ;;  %v209_v36 = vmul.f32 %v524_v1, %v74_v33  ;;  %v210_v37 = vmul.f32 %v524_v1, %v75_v34  ;;  %v76_v38 = vld [vmem:[#allocation2 + $0x190] sm:$0xff]  ;;  %v77_v39 = vld [vmem:[#allocation2 + $0x198] sm:$0xff] }
  0x2c   :  { %331 = vst [vmem:[#allocation5 + $0x150] sm:$0xff] %v203_v24  ;;  %332 = vst [vmem:[#allocation5 + $0x158] sm:$0xff] %v204_v25  ;;  %v78_v40 = vld [vmem:[#allocation2 + $0x1a0] sm:$0xff]  ;;  %v211_v41 = vmul.f32 %v524_v1, %v76_v38  ;;  %v212_v42 = vmul.f32 %v524_v1, %v77_v39  ;;  %v79_v44 = vld [vmem:[#allocation2 + $0x1a8] sm:$0xff] }
  0x2d   :  { %333 = vst [vmem:[#allocation5 + $0x160] sm:$0xff] %v205_v29  ;;  %334 = vst [vmem:[#allocation5 + $0x168] sm:$0xff] %v206_v30  ;;  %v213_v43 = vmul.f32 %v524_v1, %v78_v40  ;;  %v80_v45 = vld [vmem:[#allocation2 + $0x1b0] sm:$0xff]  ;;  %v81_v46 = vld [vmem:[#allocation2 + $0x1b8] sm:$0xff]  ;;  %v214_v47 = vmul.f32 %v524_v1, %v79_v44 }
  0x2e   :  { %335 = vst [vmem:[#allocation5 + $0x170] sm:$0xff] %v207_v31  ;;  %336 = vst [vmem:[#allocation5 + $0x178] sm:$0xff] %v208_v35  ;;  %v215_v48 = vmul.f32 %v524_v1, %v80_v45  ;;  %v216_v49 = vmul.f32 %v524_v1, %v81_v46  ;;  %v82_v50 = vld [vmem:[#allocation2 + $0x1c0] sm:$0xff]  ;;  %v83_v51 = vld [vmem:[#allocation2 + $0x1c8] sm:$0xff] }
  0x2f   :  { %337 = vst [vmem:[#allocation5 + $0x180] sm:$0xff] %v209_v36  ;;  %338 = vst [vmem:[#allocation5 + $0x188] sm:$0xff] %v210_v37  ;;  %v84_v52 = vld [vmem:[#allocation2 + $0x1d0] sm:$0xff]  ;;  %v217_v53 = vmul.f32 %v524_v1, %v82_v50  ;;  %v218_v54 = vmul.f32 %v524_v1, %v83_v51  ;;  %v85_v56 = vld [vmem:[#allocation2 + $0x1d8] sm:$0xff] }
  0x30   :  { %339 = vst [vmem:[#allocation5 + $0x190] sm:$0xff] %v211_v41  ;;  %340 = vst [vmem:[#allocation5 + $0x198] sm:$0xff] %v212_v42  ;;  %v219_v55 = vmul.f32 %v524_v1, %v84_v52  ;;  %v86_v57 = vld [vmem:[#allocation2 + $0x1e0] sm:$0xff]  ;;  %v87_v58 = vld [vmem:[#allocation2 + $0x1e8] sm:$0xff]  ;;  %v220_v59 = vmul.f32 %v524_v1, %v85_v56 }
  0x31   :  { %341 = vst [vmem:[#allocation5 + $0x1a0] sm:$0xff] %v213_v43  ;;  %342 = vst [vmem:[#allocation5 + $0x1a8] sm:$0xff] %v214_v47  ;;  %v221_v60 = vmul.f32 %v524_v1, %v86_v57  ;;  %v222_v61 = vmul.f32 %v524_v1, %v87_v58  ;;  %v88_v62 = vld [vmem:[#allocation2 + $0x1f0] sm:$0xff]  ;;  %v89_v63 = vld [vmem:[#allocation2 + $0x1f8] sm:$0xff] }
  0x32   :  { %343 = vst [vmem:[#allocation5 + $0x1b0] sm:$0xff] %v215_v48  ;;  %344 = vst [vmem:[#allocation5 + $0x1b8] sm:$0xff] %v216_v49  ;;  %v90_v0 = vld [vmem:[#allocation2 + $0x200] sm:$0xff]  ;;  %v223_v2 = vmul.f32 %v524_v1, %v88_v62  ;;  %v224_v3 = vmul.f32 %v524_v1, %v89_v63  ;;  %v91_v5 = vld [vmem:[#allocation2 + $0x208] sm:$0xff] }
  0x33   :  { %345 = vst [vmem:[#allocation5 + $0x1c0] sm:$0xff] %v217_v53  ;;  %346 = vst [vmem:[#allocation5 + $0x1c8] sm:$0xff] %v218_v54  ;;  %v225_v4 = vmul.f32 %v524_v1, %v90_v0  ;;  %v92_v6 = vld [vmem:[#allocation2 + $0x210] sm:$0xff]  ;;  %v93_v7 = vld [vmem:[#allocation2 + $0x218] sm:$0xff]  ;;  %v226_v8 = vmul.f32 %v524_v1, %v91_v5 }
  0x34   :  { %347 = vst [vmem:[#allocation5 + $0x1d0] sm:$0xff] %v219_v55  ;;  %348 = vst [vmem:[#allocation5 + $0x1d8] sm:$0xff] %v220_v59  ;;  %v227_v9 = vmul.f32 %v524_v1, %v92_v6  ;;  %v228_v10 = vmul.f32 %v524_v1, %v93_v7  ;;  %v94_v11 = vld [vmem:[#allocation2 + $0x220] sm:$0xff]  ;;  %v95_v12 = vld [vmem:[#allocation2 + $0x228] sm:$0xff] }
  0x35   :  { %349 = vst [vmem:[#allocation5 + $0x1e0] sm:$0xff] %v221_v60  ;;  %350 = vst [vmem:[#allocation5 + $0x1e8] sm:$0xff] %v222_v61  ;;  %v96_v13 = vld [vmem:[#allocation2 + $0x230] sm:$0xff]  ;;  %v229_v14 = vmul.f32 %v524_v1, %v94_v11  ;;  %v230_v15 = vmul.f32 %v524_v1, %v95_v12  ;;  %v97_v17 = vld [vmem:[#allocation2 + $0x238] sm:$0xff] }
  0x36   :  { %351 = vst [vmem:[#allocation5 + $0x1f0] sm:$0xff] %v223_v2  ;;  %352 = vst [vmem:[#allocation5 + $0x1f8] sm:$0xff] %v224_v3  ;;  %v231_v16 = vmul.f32 %v524_v1, %v96_v13  ;;  %v98_v18 = vld [vmem:[#allocation2 + $0x240] sm:$0xff]  ;;  %v99_v19 = vld [vmem:[#allocation2 + $0x248] sm:$0xff]  ;;  %v232_v20 = vmul.f32 %v524_v1, %v97_v17 }
  0x37   :  { %353 = vst [vmem:[#allocation5 + $0x200] sm:$0xff] %v225_v4  ;;  %354 = vst [vmem:[#allocation5 + $0x208] sm:$0xff] %v226_v8  ;;  %v233_v21 = vmul.f32 %v524_v1, %v98_v18  ;;  %v234_v22 = vmul.f32 %v524_v1, %v99_v19  ;;  %v100_v23 = vld [vmem:[#allocation2 + $0x250] sm:$0xff]  ;;  %v101_v24 = vld [vmem:[#allocation2 + $0x258] sm:$0xff] }
  0x38   :  { %355 = vst [vmem:[#allocation5 + $0x210] sm:$0xff] %v227_v9  ;;  %356 = vst [vmem:[#allocation5 + $0x218] sm:$0xff] %v228_v10  ;;  %v102_v25 = vld [vmem:[#allocation2 + $0x260] sm:$0xff]  ;;  %v235_v26 = vmul.f32 %v524_v1, %v100_v23  ;;  %v236_v27 = vmul.f32 %v524_v1, %v101_v24  ;;  %v103_v29 = vld [vmem:[#allocation2 + $0x268] sm:$0xff] }
  0x39   :  { %357 = vst [vmem:[#allocation5 + $0x220] sm:$0xff] %v229_v14  ;;  %358 = vst [vmem:[#allocation5 + $0x228] sm:$0xff] %v230_v15  ;;  %v237_v28 = vmul.f32 %v524_v1, %v102_v25  ;;  %v104_v30 = vld [vmem:[#allocation2 + $0x270] sm:$0xff]  ;;  %v105_v31 = vld [vmem:[#allocation2 + $0x278] sm:$0xff]  ;;  %v238_v32 = vmul.f32 %v524_v1, %v103_v29 }
  0x3a   :  { %359 = vst [vmem:[#allocation5 + $0x230] sm:$0xff] %v231_v16  ;;  %360 = vst [vmem:[#allocation5 + $0x238] sm:$0xff] %v232_v20  ;;  %v239_v33 = vmul.f32 %v524_v1, %v104_v30  ;;  %v240_v34 = vmul.f32 %v524_v1, %v105_v31  ;;  %v106_v35 = vld [vmem:[#allocation2 + $0x280] sm:$0xff]  ;;  %v107_v36 = vld [vmem:[#allocation2 + $0x288] sm:$0xff] }
  0x3b   :  { %361 = vst [vmem:[#allocation5 + $0x240] sm:$0xff] %v233_v21  ;;  %362 = vst [vmem:[#allocation5 + $0x248] sm:$0xff] %v234_v22  ;;  %v108_v37 = vld [vmem:[#allocation2 + $0x290] sm:$0xff]  ;;  %v241_v38 = vmul.f32 %v524_v1, %v106_v35  ;;  %v242_v39 = vmul.f32 %v524_v1, %v107_v36  ;;  %v109_v41 = vld [vmem:[#allocation2 + $0x298] sm:$0xff] }
  0x3c   :  { %363 = vst [vmem:[#allocation5 + $0x250] sm:$0xff] %v235_v26  ;;  %364 = vst [vmem:[#allocation5 + $0x258] sm:$0xff] %v236_v27  ;;  %v243_v40 = vmul.f32 %v524_v1, %v108_v37  ;;  %v110_v42 = vld [vmem:[#allocation2 + $0x2a0] sm:$0xff]  ;;  %v111_v43 = vld [vmem:[#allocation2 + $0x2a8] sm:$0xff]  ;;  %v244_v44 = vmul.f32 %v524_v1, %v109_v41 }
  0x3d   :  { %365 = vst [vmem:[#allocation5 + $0x260] sm:$0xff] %v237_v28  ;;  %366 = vst [vmem:[#allocation5 + $0x268] sm:$0xff] %v238_v32  ;;  %v245_v45 = vmul.f32 %v524_v1, %v110_v42  ;;  %v246_v46 = vmul.f32 %v524_v1, %v111_v43  ;;  %v112_v47 = vld [vmem:[#allocation2 + $0x2b0] sm:$0xff]  ;;  %v113_v48 = vld [vmem:[#allocation2 + $0x2b8] sm:$0xff] }
  0x3e   :  { %367 = vst [vmem:[#allocation5 + $0x270] sm:$0xff] %v239_v33  ;;  %368 = vst [vmem:[#allocation5 + $0x278] sm:$0xff] %v240_v34  ;;  %v114_v49 = vld [vmem:[#allocation2 + $0x2c0] sm:$0xff]  ;;  %v247_v50 = vmul.f32 %v524_v1, %v112_v47  ;;  %v248_v51 = vmul.f32 %v524_v1, %v113_v48  ;;  %v115_v53 = vld [vmem:[#allocation2 + $0x2c8] sm:$0xff] }
  0x3f   :  { %369 = vst [vmem:[#allocation5 + $0x280] sm:$0xff] %v241_v38  ;;  %370 = vst [vmem:[#allocation5 + $0x288] sm:$0xff] %v242_v39  ;;  %v249_v52 = vmul.f32 %v524_v1, %v114_v49  ;;  %v116_v54 = vld [vmem:[#allocation2 + $0x2d0] sm:$0xff]  ;;  %v117_v55 = vld [vmem:[#allocation2 + $0x2d8] sm:$0xff]  ;;  %v250_v56 = vmul.f32 %v524_v1, %v115_v53 }
  0x40   :  { %371 = vst [vmem:[#allocation5 + $0x290] sm:$0xff] %v243_v40  ;;  %372 = vst [vmem:[#allocation5 + $0x298] sm:$0xff] %v244_v44  ;;  %v251_v57 = vmul.f32 %v524_v1, %v116_v54  ;;  %v252_v58 = vmul.f32 %v524_v1, %v117_v55  ;;  %v118_v59 = vld [vmem:[#allocation2 + $0x2e0] sm:$0xff]  ;;  %v119_v60 = vld [vmem:[#allocation2 + $0x2e8] sm:$0xff] }
  0x41   :  { %373 = vst [vmem:[#allocation5 + $0x2a0] sm:$0xff] %v245_v45  ;;  %374 = vst [vmem:[#allocation5 + $0x2a8] sm:$0xff] %v246_v46  ;;  %v120_v61 = vld [vmem:[#allocation2 + $0x2f0] sm:$0xff]  ;;  %v253_v62 = vmul.f32 %v524_v1, %v118_v59  ;;  %v254_v63 = vmul.f32 %v524_v1, %v119_v60  ;;  %v121_v2 = vld [vmem:[#allocation2 + $0x2f8] sm:$0xff] }
  0x42   :  { %375 = vst [vmem:[#allocation5 + $0x2b0] sm:$0xff] %v247_v50  ;;  %376 = vst [vmem:[#allocation5 + $0x2b8] sm:$0xff] %v248_v51  ;;  %v255_v0 = vmul.f32 %v524_v1, %v120_v61  ;;  %v122_v3 = vld [vmem:[#allocation2 + $0x300] sm:$0xff]  ;;  %v123_v4 = vld [vmem:[#allocation2 + $0x308] sm:$0xff]  ;;  %v256_v5 = vmul.f32 %v524_v1, %v121_v2 }
  0x43   :  { %377 = vst [vmem:[#allocation5 + $0x2c0] sm:$0xff] %v249_v52  ;;  %378 = vst [vmem:[#allocation5 + $0x2c8] sm:$0xff] %v250_v56  ;;  %v257_v6 = vmul.f32 %v524_v1, %v122_v3  ;;  %v258_v7 = vmul.f32 %v524_v1, %v123_v4  ;;  %v124_v8 = vld [vmem:[#allocation2 + $0x310] sm:$0xff]  ;;  %v125_v9 = vld [vmem:[#allocation2 + $0x318] sm:$0xff] }
  0x44   :  { %379 = vst [vmem:[#allocation5 + $0x2d0] sm:$0xff] %v251_v57  ;;  %380 = vst [vmem:[#allocation5 + $0x2d8] sm:$0xff] %v252_v58  ;;  %v126_v10 = vld [vmem:[#allocation2 + $0x320] sm:$0xff]  ;;  %v259_v11 = vmul.f32 %v524_v1, %v124_v8  ;;  %v260_v12 = vmul.f32 %v524_v1, %v125_v9  ;;  %v127_v14 = vld [vmem:[#allocation2 + $0x328] sm:$0xff] }
  0x45   :  { %381 = vst [vmem:[#allocation5 + $0x2e0] sm:$0xff] %v253_v62  ;;  %382 = vst [vmem:[#allocation5 + $0x2e8] sm:$0xff] %v254_v63  ;;  %v261_v13 = vmul.f32 %v524_v1, %v126_v10  ;;  %v128_v15 = vld [vmem:[#allocation2 + $0x330] sm:$0xff]  ;;  %v129_v16 = vld [vmem:[#allocation2 + $0x338] sm:$0xff]  ;;  %v262_v17 = vmul.f32 %v524_v1, %v127_v14 }
  0x46   :  { %383 = vst [vmem:[#allocation5 + $0x2f0] sm:$0xff] %v255_v0  ;;  %384 = vst [vmem:[#allocation5 + $0x2f8] sm:$0xff] %v256_v5  ;;  %v263_v18 = vmul.f32 %v524_v1, %v128_v15  ;;  %v264_v19 = vmul.f32 %v524_v1, %v129_v16  ;;  %v130_v20 = vld [vmem:[#allocation2 + $0x340] sm:$0xff]  ;;  %v131_v21 = vld [vmem:[#allocation2 + $0x348] sm:$0xff] }
  0x47   :  { %385 = vst [vmem:[#allocation5 + $0x300] sm:$0xff] %v257_v6  ;;  %386 = vst [vmem:[#allocation5 + $0x308] sm:$0xff] %v258_v7  ;;  %v132_v22 = vld [vmem:[#allocation2 + $0x350] sm:$0xff]  ;;  %v265_v23 = vmul.f32 %v524_v1, %v130_v20  ;;  %v266_v24 = vmul.f32 %v524_v1, %v131_v21  ;;  %v133_v26 = vld [vmem:[#allocation2 + $0x358] sm:$0xff] }
  0x48   :  { %387 = vst [vmem:[#allocation5 + $0x310] sm:$0xff] %v259_v11  ;;  %388 = vst [vmem:[#allocation5 + $0x318] sm:$0xff] %v260_v12  ;;  %v267_v25 = vmul.f32 %v524_v1, %v132_v22  ;;  %v134_v27 = vld [vmem:[#allocation2 + $0x360] sm:$0xff]  ;;  %v135_v28 = vld [vmem:[#allocation2 + $0x368] sm:$0xff]  ;;  %v268_v29 = vmul.f32 %v524_v1, %v133_v26 }
  0x49   :  { %389 = vst [vmem:[#allocation5 + $0x320] sm:$0xff] %v261_v13  ;;  %390 = vst [vmem:[#allocation5 + $0x328] sm:$0xff] %v262_v17  ;;  %v269_v30 = vmul.f32 %v524_v1, %v134_v27  ;;  %v270_v31 = vmul.f32 %v524_v1, %v135_v28  ;;  %v136_v32 = vld [vmem:[#allocation2 + $0x370] sm:$0xff]  ;;  %v137_v33 = vld [vmem:[#allocation2 + $0x378] sm:$0xff] }
  0x4a   :  { %391 = vst [vmem:[#allocation5 + $0x330] sm:$0xff] %v263_v18  ;;  %392 = vst [vmem:[#allocation5 + $0x338] sm:$0xff] %v264_v19  ;;  %v138_v34 = vld [vmem:[#allocation2 + $0x380] sm:$0xff]  ;;  %v271_v35 = vmul.f32 %v524_v1, %v136_v32  ;;  %v272_v36 = vmul.f32 %v524_v1, %v137_v33  ;;  %v139_v38 = vld [vmem:[#allocation2 + $0x388] sm:$0xff] }
  0x4b   :  { %393 = vst [vmem:[#allocation5 + $0x340] sm:$0xff] %v265_v23  ;;  %394 = vst [vmem:[#allocation5 + $0x348] sm:$0xff] %v266_v24  ;;  %v273_v37 = vmul.f32 %v524_v1, %v138_v34  ;;  %v140_v39 = vld [vmem:[#allocation2 + $0x390] sm:$0xff]  ;;  %v141_v40 = vld [vmem:[#allocation2 + $0x398] sm:$0xff]  ;;  %v274_v41 = vmul.f32 %v524_v1, %v139_v38 }
  0x4c   :  { %395 = vst [vmem:[#allocation5 + $0x350] sm:$0xff] %v267_v25  ;;  %396 = vst [vmem:[#allocation5 + $0x358] sm:$0xff] %v268_v29  ;;  %v275_v42 = vmul.f32 %v524_v1, %v140_v39  ;;  %v276_v43 = vmul.f32 %v524_v1, %v141_v40  ;;  %v142_v44 = vld [vmem:[#allocation2 + $0x3a0] sm:$0xff]  ;;  %v143_v45 = vld [vmem:[#allocation2 + $0x3a8] sm:$0xff] }
  0x4d   :  { %397 = vst [vmem:[#allocation5 + $0x360] sm:$0xff] %v269_v30  ;;  %398 = vst [vmem:[#allocation5 + $0x368] sm:$0xff] %v270_v31  ;;  %v144_v46 = vld [vmem:[#allocation2 + $0x3b0] sm:$0xff]  ;;  %v277_v47 = vmul.f32 %v524_v1, %v142_v44  ;;  %v278_v48 = vmul.f32 %v524_v1, %v143_v45  ;;  %v145_v50 = vld [vmem:[#allocation2 + $0x3b8] sm:$0xff] }
  0x4e   :  { %399 = vst [vmem:[#allocation5 + $0x370] sm:$0xff] %v271_v35  ;;  %400 = vst [vmem:[#allocation5 + $0x378] sm:$0xff] %v272_v36  ;;  %v279_v49 = vmul.f32 %v524_v1, %v144_v46  ;;  %v146_v51 = vld [vmem:[#allocation2 + $0x3c0] sm:$0xff]  ;;  %v147_v52 = vld [vmem:[#allocation2 + $0x3c8] sm:$0xff]  ;;  %v280_v53 = vmul.f32 %v524_v1, %v145_v50 }
  0x4f   :  { %401 = vst [vmem:[#allocation5 + $0x380] sm:$0xff] %v273_v37  ;;  %402 = vst [vmem:[#allocation5 + $0x388] sm:$0xff] %v274_v41  ;;  %v281_v54 = vmul.f32 %v524_v1, %v146_v51  ;;  %v282_v55 = vmul.f32 %v524_v1, %v147_v52  ;;  %v148_v56 = vld [vmem:[#allocation2 + $0x3d0] sm:$0xff]  ;;  %v149_v57 = vld [vmem:[#allocation2 + $0x3d8] sm:$0xff] }
  0x50   :  { %403 = vst [vmem:[#allocation5 + $0x390] sm:$0xff] %v275_v42  ;;  %404 = vst [vmem:[#allocation5 + $0x398] sm:$0xff] %v276_v43  ;;  %v150_v58 = vld [vmem:[#allocation2 + $0x3e0] sm:$0xff]  ;;  %v283_v59 = vmul.f32 %v524_v1, %v148_v56  ;;  %v284_v60 = vmul.f32 %v524_v1, %v149_v57  ;;  %v151_v62 = vld [vmem:[#allocation2 + $0x3e8] sm:$0xff] }
  0x51   :  { %405 = vst [vmem:[#allocation5 + $0x3a0] sm:$0xff] %v277_v47  ;;  %406 = vst [vmem:[#allocation5 + $0x3a8] sm:$0xff] %v278_v48  ;;  %v285_v61 = vmul.f32 %v524_v1, %v150_v58  ;;  %v152_v63 = vld [vmem:[#allocation2 + $0x3f0] sm:$0xff]  ;;  %v153_v0 = vld [vmem:[#allocation2 + $0x3f8] sm:$0xff]  ;;  %v286_v2 = vmul.f32 %v524_v1, %v151_v62 }
  0x52   :  { %407 = vst [vmem:[#allocation5 + $0x3b0] sm:$0xff] %v279_v49  ;;  %408 = vst [vmem:[#allocation5 + $0x3b8] sm:$0xff] %v280_v53  ;;  %v287_v3 = vmul.f32 %v524_v1, %v152_v63  ;;  %v288_v4 = vmul.f32 %v524_v1, %v153_v0 }
  0x53   :  { %409 = vst [vmem:[#allocation5 + $0x3c0] sm:$0xff] %v281_v54  ;;  %410 = vst [vmem:[#allocation5 + $0x3c8] sm:$0xff] %v282_v55 }
  0x54   :  { %411 = vst [vmem:[#allocation5 + $0x3d0] sm:$0xff] %v283_v59  ;;  %412 = vst [vmem:[#allocation5 + $0x3d8] sm:$0xff] %v284_v60 }
  0x55   :  { %413 = vst [vmem:[#allocation5 + $0x3e0] sm:$0xff] %v285_v61  ;;  %414 = vst [vmem:[#allocation5 + $0x3e8] sm:$0xff] %v286_v2 }
  0x56   :  { %415 = vst [vmem:[#allocation5 + $0x3f0] sm:$0xff] %v287_v3  ;;  %416 = vst [vmem:[#allocation5 + $0x3f8] sm:$0xff] %v288_v4 }
  0x57   :  { %472 = shalt.err (!%p469_p12)
}
  0x58   :  { %s473_s28 = scalar_lea.hbm %s671_s2, 16384 }
  0x59   :  { %p474_p13 = scmp.ne.s32.totalorder %s671_s2, %s473_s28  ;;  %p477_p0 = scmp.lt.u32.totalorder %s473_s28, %s671_s2 }
  0x5b   :  { %p479_p1 = pnand %p477_p0, %p474_p13 }
  0x5d   :  { %482 = shalt.err (!%p479_p1)
}
  0x5e   :  { %428 = dma.vmem_to_hbm [thread:$0]  %s423_s1, 16384, %s671_s2, [#allocation4], %s488_s19, %s488_s19, %s489_s20  }
  0x5f   :  { %485 = dma.done.wait [#allocation4], 16384  }
  0x60   :  { %486 = vsyncadd [#allocation4], 4294950912 }
  0x61   :  { %432 = vsyncpa [#allocation3], 1 }
  0x62   :  { %433 = vsyncpa [#allocation4], 1 }

</bundles_post_ra>
